<compile_context>
chip_gen: v6e
topology: v6e:2x2x1
jax: 0.10.0
libtpu: 0.0.40
codegen_flags: <defaults>
</compile_context>

<pallas_src>
import numpy as np
import jax
import jax.numpy as jnp
from jax import lax
from jax.experimental import pallas as pl
from jax.experimental.pallas import tpu as pltpu

NUM_DATA_QUBITS = 5
NUM_ANCILLA = 2
NUM_QUBITS = NUM_DATA_QUBITS + NUM_ANCILLA   # 7
DDATA = 2 ** NUM_DATA_QUBITS                 # 32  (data-register dimension, kernel D)
DIM = 2 ** NUM_QUBITS                        # 128 (full register, host/reference only)
NOBS = 5                                     # z,x,y on ancilla0; z,x on ancilla1
BATCH = 8
ND = NOBS * DDATA                            # 160
OUT_LANES = 128                              # lane-dense padded output width


# ----------------------------------------------------------------------------
# Glue: build the variational-circuit unitary and the observables (numpy)
# ----------------------------------------------------------------------------
_X = np.array([[0, 1], [1, 0]], dtype=np.complex128)
_Y = np.array([[0, -1j], [1j, 0]], dtype=np.complex128)
_Z = np.array([[1, 0], [0, -1]], dtype=np.complex128)
_P0 = np.array([[1, 0], [0, 0]], dtype=np.complex128)
_P1 = np.array([[0, 0], [0, 1]], dtype=np.complex128)


def _embed1(g, wire, nq):
    # wire 0 is the most-significant bit of the basis index (deepquantum convention)
    return np.kron(np.kron(np.eye(2 ** wire), g), np.eye(2 ** (nq - wire - 1)))


def _cnot_mat(ctrl, tgt, nq):
    return _embed1(_P0, ctrl, nq) + _embed1(_P1, ctrl, nq) @ _embed1(_X, tgt, nq)


def _u3_mat(theta, phi, lam):
    c, s = np.cos(theta / 2), np.sin(theta / 2)
    return np.array([[c, -np.exp(1j * lam) * s],
                     [np.exp(1j * phi) * s, np.exp(1j * (phi + lam)) * c]],
                    dtype=np.complex128)


def _ry_mat(theta):
    c, s = np.cos(theta / 2), np.sin(theta / 2)
    return np.array([[c, -s], [s, c]], dtype=np.complex128)


def _rz_mat(theta):
    return np.array([[np.exp(-1j * theta / 2), 0],
                     [0, np.exp(1j * theta / 2)]], dtype=np.complex128)


def build_circuit_unitary(nq, rng):
    """'U-V all' branch of create_var_circuit, generalized from 12+2 to nq qubits."""
    U = np.eye(2 ** nq, dtype=np.complex128)

    def apply(g):
        nonlocal U
        U = g @ U

    def u3(w):
        apply(_embed1(_u3_mat(*rng.uniform(0.0, 2 * np.pi, 3)), w, nq))

    def ry(w):
        apply(_embed1(_ry_mat(rng.uniform(0.0, 2 * np.pi)), w, nq))

    def rz(w):
        apply(_embed1(_rz_mat(rng.uniform(0.0, 2 * np.pi)), w, nq))

    def cnot(c, t):
        apply(_cnot_mat(c, t, nq))

    def cu3(t, c):
        g = _u3_mat(*rng.uniform(0.0, 2 * np.pi, 3))
        apply(_embed1(_P0, c, nq) + _embed1(_P1, c, nq) @ _embed1(g, t, nq))

    def add_U(i, j):
        u3(i); u3(j); cnot(j, i); rz(i); ry(j); cnot(i, j); ry(j); cnot(j, i); u3(i); u3(j)

    def add_V(i, j):
        u3(i)
        g = _u3_mat(*rng.uniform(0.0, 2 * np.pi, 3))
        apply(_embed1(g, j, nq))
        cnot(i, j)
        apply(_embed1(g.conj().T, j, nq))   # g.inverse()

    # 'U-V all': num_layers forced to 1; every wire pair (i < j) gets add_U, add_V
    for i in range(nq - 1):
        for j in range(i + 1, nq):
            add_U(i, j)
            add_V(i, j)

    # controlled-U3 readout onto the two ancillas (wires nq-2, nq-1); the original
    # uses controls range(6) / range(7, 12) for 12 data qubits - scaled down here.
    ndata = nq - NUM_ANCILLA
    for i in range(ndata // 2):
        cu3(nq - 2, i)
    for i in range(ndata // 2 + 1, ndata):
        cu3(nq - 1, i)
    return U


def build_observables(nq):
    a0, a1 = nq - 2, nq - 1   # the two ancilla wires (12, 13 in the original)
    obs = [_embed1(_Z, a0, nq), _embed1(_X, a0, nq), _embed1(_Y, a0, nq),
           _embed1(_Z, a1, nq), _embed1(_X, a1, nq)]
    return np.stack(obs, axis=0)            # [NOBS, DIM, DIM]


# ----------------------------------------------------------------------------
# Pallas kernel: expectations of the circuit+ancilla-folded observables + CE loss
# ----------------------------------------------------------------------------
def qnn_kernel(zs_ref, a_ref, y_ref, out_ref):
    f32 = jnp.float32
    B, nobs, D, nd = BATCH, NOBS, DDATA, ND

    zs = zs_ref[...]                                   # [2B, D] f32 (kept for VPU side)
    zs_bf = zs.astype(jnp.bfloat16)                    # MXU operand only
    # Single MXU push: [2B, D] x [D, 2*NOBS*D] bf16, f32 accumulation.
    p = jnp.dot(zs_bf, a_ref[...], preferred_element_type=f32)   # [2B, 2*nd]

    zr = zs[0:B, :]                                    # [B, D] f32
    zi = zs[B:2 * B, :]                                # [B, D] f32

    # Per-observable (unrolled): m_o = A'_o z (complex), E_o = Re(z^H m_o).
    # A'_o is Hermitian (principal submatrix of U^H O_o U), so Re() is exact.
    e_cols = []
    for o in range(nobs):
        lo = o * D
        ar_zr = p[0:B, lo:lo + D]                      # Re(A') zr
        ai_zr = p[0:B, nd + lo:nd + lo + D]            # Im(A') zr
        ar_zi = p[B:2 * B, lo:lo + D]                  # Re(A') zi
        ai_zi = p[B:2 * B, nd + lo:nd + lo + D]        # Im(A') zi
        mr = ar_zr - ai_zi                             # Re(A' z)
        mi = ar_zi + ai_zr                             # Im(A' z)
        e_cols.append(jnp.sum(zr * mr + zi * mi, axis=-1, keepdims=True))
    E = jnp.concatenate(e_cols, axis=-1)               # [B, NOBS] f32

    # cross_entropy(E, y), mean reduction (exp/log run on the EUP slot)
    mrow = jnp.max(E, axis=-1, keepdims=True)
    lse = mrow + jnp.log(jnp.sum(jnp.exp(E - mrow), axis=-1, keepdims=True))

    # picked[b] = E[b, y[b]] via iota mask built from SMEM scalar reads of y.
    row_iota = lax.broadcasted_iota(jnp.int32, (B, nobs), 0)
    col_iota = lax.broadcasted_iota(jnp.int32, (B, nobs), 1)
    mask = jnp.zeros((B, nobs), jnp.bool_)
    for b in range(B):
        mask = jnp.logical_or(mask,
                              jnp.logical_and(row_iota == b, col_iota == y_ref[b]))
    picked = jnp.sum(jnp.where(mask, E, 0.0), axis=-1, keepdims=True)   # [B, 1]
    loss = jnp.sum(lse - picked) * (1.0 / B)

    # Single lane-dense unmasked store: lanes [0:NOBS]=E, lane NOBS=loss, rest 0.
    loss_col = jnp.zeros((B, 1), f32) + loss
    pad = jnp.zeros((B, OUT_LANES - nobs - 1), f32)
    out_ref[...] = jnp.concatenate([E, loss_col, pad], axis=-1)


def qnn_forward_impl(zr, zi, y, rhs2):
    # Stack re/im on the M axis; keep f32 (only 8 KB), the kernel casts for the MXU.
    zs = jnp.concatenate([zr, zi], axis=0).astype(jnp.float32)           # [2B, 32]
    vm = pl.BlockSpec(memory_space=pltpu.MemorySpace.VMEM)
    sm = pl.BlockSpec(memory_space=pltpu.MemorySpace.SMEM)
    out_pad = pl.pallas_call(
        qnn_kernel,
        out_shape=jax.ShapeDtypeStruct((BATCH, OUT_LANES), jnp.float32),
        in_specs=[vm, vm, sm],
        out_specs=vm,
    )(zs, rhs2, y.astype(jnp.int32))
    loss = out_pad[0, NOBS]
    out = out_pad[:, :NOBS]
    return loss, out


qnn_forward = jax.jit(qnn_forward_impl)


# ----------------------------------------------------------------------------
# Reference (float64 numpy) for a correctness check
# ----------------------------------------------------------------------------
def reference_forward(z, U, Obs, y):
    anc0 = np.zeros(2 ** NUM_ANCILLA, dtype=np.complex128)
    anc0[0] = 1.0
    z_ext = np.kron(z, anc0)                                # [B, DIM]
    psi = z_ext @ U.T                                       # psi_b = U z_ext_b
    E = np.real(np.einsum('bj,ojk,bk->bo', psi.conj(), Obs, psi))
    m = E.max(axis=-1, keepdims=True)
    lse = m + np.log(np.exp(E - m).sum(axis=-1, keepdims=True))
    picked = E[np.arange(E.shape[0]), y][:, None]
    loss = float(np.mean(lse - picked))
    return loss, E


if __name__ == "__main__":
    # deterministic circuit parameters and observables
    rng = np.random.default_rng(0)
    U = build_circuit_unitary(NUM_QUBITS, rng)              # [DIM, DIM] complex
    Obs = build_observables(NUM_QUBITS)                     # [NOBS, DIM, DIM] complex

    # Fold circuit into observables (A_o = U^H O_o U, Hermitian), then fold the |00>
    # ancilla projection: z_ext is nonzero only at indices 4*i, so only the principal
    # (still Hermitian) submatrix A'[0::4, 0::4] contributes.
    A = np.einsum('ij,ojk,kl->oil', U.conj().T, Obs, U)     # [NOBS, DIM, DIM]
    Af = A[:, 0::4, 0::4]                                   # [NOBS, 32, 32]
    AfT = np.ascontiguousarray(Af.reshape(NOBS * DDATA, DDATA).T)       # [32, 160]
    rhs2 = jnp.asarray(np.concatenate([AfT.real, AfT.imag], axis=1),
                       dtype=jnp.bfloat16)                  # [32, 320] (~20 KB)

    # deterministic inputs: normalized complex data states + integer labels
    key = jax.random.PRNGKey(0)
    k1, k2, k3 = jax.random.split(key, 3)
    zr0 = jax.random.normal(k1, (BATCH, DDATA), dtype=jnp.float32)
    zi0 = jax.random.normal(k2, (BATCH, DDATA), dtype=jnp.float32)
    nrm = jnp.sqrt(jnp.sum(zr0 * zr0 + zi0 * zi0, axis=-1, keepdims=True))
    zr, zi = zr0 / nrm, zi0 / nrm
    y = jax.random.randint(k3, (BATCH,), 0, NOBS, dtype=jnp.int32)

    loss, out = qnn_forward(zr, zi, y, rhs2)
    jax.block_until_ready((loss, out))

    # correctness check against the float64 reference (bf16 operator quantization
    # bounds the error well inside these tolerances)
    z_np = np.asarray(zr, dtype=np.float64) + 1j * np.asarray(zi, dtype=np.float64)
    ref_loss, ref_out = reference_forward(z_np, U, Obs, np.asarray(y))
    np.testing.assert_allclose(float(loss), ref_loss, rtol=5e-2, atol=3e-2)
    np.testing.assert_allclose(np.asarray(out, dtype=np.float64), ref_out,
                               rtol=5e-2, atol=3e-2)

    print("KERNEL_OK")
</pallas_src>

<mosaic_0001>
module attributes {stable_mosaic.version = 11 : i64} {
  func.func @qnn_kernel(%arg0: memref<16x32xf32, #tpu.memory_space<vmem>>, %arg1: memref<32x320xbf16, #tpu.memory_space<vmem>>, %arg2: memref<8xi32, #tpu.memory_space<smem>>, %arg3: memref<8x128xf32, #tpu.memory_space<vmem>>) attributes {dimension_semantics = [], scalar_prefetch = 0 : i64, scratch_operands = 0 : i64, tpu.core_type = #tpu.core_type<tc>} {
    %c0 = arith.constant 0 : index
    %c0_0 = arith.constant 0 : index
    %0 = vector.load %arg0[%c0, %c0_0] : memref<16x32xf32, #tpu.memory_space<vmem>>, vector<16x32xf32>
    %1 = arith.truncf %0 : vector<16x32xf32> to vector<16x32xbf16>
    %c0_1 = arith.constant 0 : index
    %c0_2 = arith.constant 0 : index
    %2 = vector.load %arg1[%c0_1, %c0_2] : memref<32x320xbf16, #tpu.memory_space<vmem>>, vector<32x320xbf16>
    %cst = arith.constant dense<0.000000e+00> : vector<16x320xf32>
    %3 = tpu.matmul %1, %2, %cst {dimension_numbers = #tpu.dot_dimension_numbers<[1], [0], [0], [1], [0, 0, 1, 1], [], []>} : vector<16x32xbf16>, vector<32x320xbf16>, vector<16x320xf32> -> vector<16x320xf32>
    %4 = vector.extract_strided_slice %0 {offsets = [0, 0], sizes = [8, 32], strides = [1, 1]} : vector<16x32xf32> to vector<8x32xf32>
    %5 = vector.extract_strided_slice %0 {offsets = [8, 0], sizes = [8, 32], strides = [1, 1]} : vector<16x32xf32> to vector<8x32xf32>
    %6 = vector.extract_strided_slice %3 {offsets = [0, 0], sizes = [8, 32], strides = [1, 1]} : vector<16x320xf32> to vector<8x32xf32>
    %7 = vector.extract_strided_slice %3 {offsets = [0, 160], sizes = [8, 32], strides = [1, 1]} : vector<16x320xf32> to vector<8x32xf32>
    %8 = vector.extract_strided_slice %3 {offsets = [8, 0], sizes = [8, 32], strides = [1, 1]} : vector<16x320xf32> to vector<8x32xf32>
    %9 = vector.extract_strided_slice %3 {offsets = [8, 160], sizes = [8, 32], strides = [1, 1]} : vector<16x320xf32> to vector<8x32xf32>
    %10 = arith.subf %6, %9 : vector<8x32xf32>
    %11 = arith.addf %8, %7 : vector<8x32xf32>
    %12 = arith.mulf %4, %10 : vector<8x32xf32>
    %13 = arith.mulf %5, %11 : vector<8x32xf32>
    %14 = arith.addf %12, %13 : vector<8x32xf32>
    %cst_3 = arith.constant dense<0.000000e+00> : vector<8xf32>
    %15 = vector.multi_reduction <add>, %14, %cst_3 [1] : vector<8x32xf32> to vector<8xf32>
    %16 = vector.shape_cast %15 : vector<8xf32> to vector<8x1xf32>
    %17 = vector.extract_strided_slice %3 {offsets = [0, 32], sizes = [8, 32], strides = [1, 1]} : vector<16x320xf32> to vector<8x32xf32>
    %18 = vector.extract_strided_slice %3 {offsets = [0, 192], sizes = [8, 32], strides = [1, 1]} : vector<16x320xf32> to vector<8x32xf32>
    %19 = vector.extract_strided_slice %3 {offsets = [8, 32], sizes = [8, 32], strides = [1, 1]} : vector<16x320xf32> to vector<8x32xf32>
    %20 = vector.extract_strided_slice %3 {offsets = [8, 192], sizes = [8, 32], strides = [1, 1]} : vector<16x320xf32> to vector<8x32xf32>
    %21 = arith.subf %17, %20 : vector<8x32xf32>
    %22 = arith.addf %19, %18 : vector<8x32xf32>
    %23 = arith.mulf %4, %21 : vector<8x32xf32>
    %24 = arith.mulf %5, %22 : vector<8x32xf32>
    %25 = arith.addf %23, %24 : vector<8x32xf32>
    %cst_4 = arith.constant dense<0.000000e+00> : vector<8xf32>
    %26 = vector.multi_reduction <add>, %25, %cst_4 [1] : vector<8x32xf32> to vector<8xf32>
    %27 = vector.shape_cast %26 : vector<8xf32> to vector<8x1xf32>
    %28 = vector.extract_strided_slice %3 {offsets = [0, 64], sizes = [8, 32], strides = [1, 1]} : vector<16x320xf32> to vector<8x32xf32>
    %29 = vector.extract_strided_slice %3 {offsets = [0, 224], sizes = [8, 32], strides = [1, 1]} : vector<16x320xf32> to vector<8x32xf32>
    %30 = vector.extract_strided_slice %3 {offsets = [8, 64], sizes = [8, 32], strides = [1, 1]} : vector<16x320xf32> to vector<8x32xf32>
    %31 = vector.extract_strided_slice %3 {offsets = [8, 224], sizes = [8, 32], strides = [1, 1]} : vector<16x320xf32> to vector<8x32xf32>
    %32 = arith.subf %28, %31 : vector<8x32xf32>
    %33 = arith.addf %30, %29 : vector<8x32xf32>
    %34 = arith.mulf %4, %32 : vector<8x32xf32>
    %35 = arith.mulf %5, %33 : vector<8x32xf32>
    %36 = arith.addf %34, %35 : vector<8x32xf32>
    %cst_5 = arith.constant dense<0.000000e+00> : vector<8xf32>
    %37 = vector.multi_reduction <add>, %36, %cst_5 [1] : vector<8x32xf32> to vector<8xf32>
    %38 = vector.shape_cast %37 : vector<8xf32> to vector<8x1xf32>
    %39 = vector.extract_strided_slice %3 {offsets = [0, 96], sizes = [8, 32], strides = [1, 1]} : vector<16x320xf32> to vector<8x32xf32>
    %40 = vector.extract_strided_slice %3 {offsets = [0, 256], sizes = [8, 32], strides = [1, 1]} : vector<16x320xf32> to vector<8x32xf32>
    %41 = vector.extract_strided_slice %3 {offsets = [8, 96], sizes = [8, 32], strides = [1, 1]} : vector<16x320xf32> to vector<8x32xf32>
    %42 = vector.extract_strided_slice %3 {offsets = [8, 256], sizes = [8, 32], strides = [1, 1]} : vector<16x320xf32> to vector<8x32xf32>
    %43 = arith.subf %39, %42 : vector<8x32xf32>
    %44 = arith.addf %41, %40 : vector<8x32xf32>
    %45 = arith.mulf %4, %43 : vector<8x32xf32>
    %46 = arith.mulf %5, %44 : vector<8x32xf32>
    %47 = arith.addf %45, %46 : vector<8x32xf32>
    %cst_6 = arith.constant dense<0.000000e+00> : vector<8xf32>
    %48 = vector.multi_reduction <add>, %47, %cst_6 [1] : vector<8x32xf32> to vector<8xf32>
    %49 = vector.shape_cast %48 : vector<8xf32> to vector<8x1xf32>
    %50 = vector.extract_strided_slice %3 {offsets = [0, 128], sizes = [8, 32], strides = [1, 1]} : vector<16x320xf32> to vector<8x32xf32>
    %51 = vector.extract_strided_slice %3 {offsets = [0, 288], sizes = [8, 32], strides = [1, 1]} : vector<16x320xf32> to vector<8x32xf32>
    %52 = vector.extract_strided_slice %3 {offsets = [8, 128], sizes = [8, 32], strides = [1, 1]} : vector<16x320xf32> to vector<8x32xf32>
    %53 = vector.extract_strided_slice %3 {offsets = [8, 288], sizes = [8, 32], strides = [1, 1]} : vector<16x320xf32> to vector<8x32xf32>
    %54 = arith.subf %50, %53 : vector<8x32xf32>
    %55 = arith.addf %52, %51 : vector<8x32xf32>
    %56 = arith.mulf %4, %54 : vector<8x32xf32>
    %57 = arith.mulf %5, %55 : vector<8x32xf32>
    %58 = arith.addf %56, %57 : vector<8x32xf32>
    %cst_7 = arith.constant dense<0.000000e+00> : vector<8xf32>
    %59 = vector.multi_reduction <add>, %58, %cst_7 [1] : vector<8x32xf32> to vector<8xf32>
    %60 = vector.shape_cast %59 : vector<8xf32> to vector<8x1xf32>
    %61 = tpu.concatenate %16, %27, %38, %49, %60 in 1 : vector<8x1xf32>, vector<8x1xf32>, vector<8x1xf32>, vector<8x1xf32>, vector<8x1xf32> -> vector<8x5xf32>
    %cst_8 = arith.constant dense<0xFF800000> : vector<8xf32>
    %62 = vector.multi_reduction <maximumf>, %61, %cst_8 [1] : vector<8x5xf32> to vector<8xf32>
    %63 = vector.shape_cast %62 : vector<8xf32> to vector<8x1xf32>
    %64 = vector.broadcast %63 : vector<8x1xf32> to vector<8x5xf32>
    %65 = arith.subf %61, %64 : vector<8x5xf32>
    %66 = math.exp %65 : vector<8x5xf32>
    %cst_9 = arith.constant dense<0.000000e+00> : vector<8xf32>
    %67 = vector.multi_reduction <add>, %66, %cst_9 [1] : vector<8x5xf32> to vector<8xf32>
    %68 = vector.shape_cast %67 : vector<8xf32> to vector<8x1xf32>
    %69 = math.log %68 : vector<8x1xf32>
    %70 = arith.addf %63, %69 : vector<8x1xf32>
    %71 = tpu.iota {dimensions = array<i32: 0>} : vector<8x5xi32>
    %72 = tpu.iota {dimensions = array<i32: 1>} : vector<8x5xi32>
    %false = arith.constant false
    %73 = vector.broadcast %false : i1 to vector<8x5xi1>
    %c0_i32 = arith.constant 0 : i32
    %74 = vector.broadcast %c0_i32 : i32 to vector<8x5xi32>
    %75 = arith.cmpi eq, %71, %74 : vector<8x5xi32>
    %c0_10 = arith.constant 0 : index
    %76 = memref.load %arg2[%c0_10] : memref<8xi32, #tpu.memory_space<smem>>
    %77 = vector.broadcast %76 : i32 to vector<8x5xi32>
    %78 = arith.cmpi eq, %72, %77 : vector<8x5xi32>
    %79 = arith.andi %75, %78 : vector<8x5xi1>
    %80 = arith.ori %73, %79 : vector<8x5xi1>
    %c1_i32 = arith.constant 1 : i32
    %81 = vector.broadcast %c1_i32 : i32 to vector<8x5xi32>
    %82 = arith.cmpi eq, %71, %81 : vector<8x5xi32>
    %c1 = arith.constant 1 : index
    %83 = memref.load %arg2[%c1] : memref<8xi32, #tpu.memory_space<smem>>
    %84 = vector.broadcast %83 : i32 to vector<8x5xi32>
    %85 = arith.cmpi eq, %72, %84 : vector<8x5xi32>
    %86 = arith.andi %82, %85 : vector<8x5xi1>
    %87 = arith.ori %80, %86 : vector<8x5xi1>
    %c2_i32 = arith.constant 2 : i32
    %88 = vector.broadcast %c2_i32 : i32 to vector<8x5xi32>
    %89 = arith.cmpi eq, %71, %88 : vector<8x5xi32>
    %c2 = arith.constant 2 : index
    %90 = memref.load %arg2[%c2] : memref<8xi32, #tpu.memory_space<smem>>
    %91 = vector.broadcast %90 : i32 to vector<8x5xi32>
    %92 = arith.cmpi eq, %72, %91 : vector<8x5xi32>
    %93 = arith.andi %89, %92 : vector<8x5xi1>
    %94 = arith.ori %87, %93 : vector<8x5xi1>
    %c3_i32 = arith.constant 3 : i32
    %95 = vector.broadcast %c3_i32 : i32 to vector<8x5xi32>
    %96 = arith.cmpi eq, %71, %95 : vector<8x5xi32>
    %c3 = arith.constant 3 : index
    %97 = memref.load %arg2[%c3] : memref<8xi32, #tpu.memory_space<smem>>
    %98 = vector.broadcast %97 : i32 to vector<8x5xi32>
    %99 = arith.cmpi eq, %72, %98 : vector<8x5xi32>
    %100 = arith.andi %96, %99 : vector<8x5xi1>
    %101 = arith.ori %94, %100 : vector<8x5xi1>
    %c4_i32 = arith.constant 4 : i32
    %102 = vector.broadcast %c4_i32 : i32 to vector<8x5xi32>
    %103 = arith.cmpi eq, %71, %102 : vector<8x5xi32>
    %c4 = arith.constant 4 : index
    %104 = memref.load %arg2[%c4] : memref<8xi32, #tpu.memory_space<smem>>
    %105 = vector.broadcast %104 : i32 to vector<8x5xi32>
    %106 = arith.cmpi eq, %72, %105 : vector<8x5xi32>
    %107 = arith.andi %103, %106 : vector<8x5xi1>
    %108 = arith.ori %101, %107 : vector<8x5xi1>
    %c5_i32 = arith.constant 5 : i32
    %109 = vector.broadcast %c5_i32 : i32 to vector<8x5xi32>
    %110 = arith.cmpi eq, %71, %109 : vector<8x5xi32>
    %c5 = arith.constant 5 : index
    %111 = memref.load %arg2[%c5] : memref<8xi32, #tpu.memory_space<smem>>
    %112 = vector.broadcast %111 : i32 to vector<8x5xi32>
    %113 = arith.cmpi eq, %72, %112 : vector<8x5xi32>
    %114 = arith.andi %110, %113 : vector<8x5xi1>
    %115 = arith.ori %108, %114 : vector<8x5xi1>
    %c6_i32 = arith.constant 6 : i32
    %116 = vector.broadcast %c6_i32 : i32 to vector<8x5xi32>
    %117 = arith.cmpi eq, %71, %116 : vector<8x5xi32>
    %c6 = arith.constant 6 : index
    %118 = memref.load %arg2[%c6] : memref<8xi32, #tpu.memory_space<smem>>
    %119 = vector.broadcast %118 : i32 to vector<8x5xi32>
    %120 = arith.cmpi eq, %72, %119 : vector<8x5xi32>
    %121 = arith.andi %117, %120 : vector<8x5xi1>
    %122 = arith.ori %115, %121 : vector<8x5xi1>
    %c7_i32 = arith.constant 7 : i32
    %123 = vector.broadcast %c7_i32 : i32 to vector<8x5xi32>
    %124 = arith.cmpi eq, %71, %123 : vector<8x5xi32>
    %c7 = arith.constant 7 : index
    %125 = memref.load %arg2[%c7] : memref<8xi32, #tpu.memory_space<smem>>
    %126 = vector.broadcast %125 : i32 to vector<8x5xi32>
    %127 = arith.cmpi eq, %72, %126 : vector<8x5xi32>
    %128 = arith.andi %124, %127 : vector<8x5xi1>
    %129 = arith.ori %122, %128 : vector<8x5xi1>
    %cst_11 = arith.constant 0.000000e+00 : f32
    %130 = vector.broadcast %cst_11 : f32 to vector<8x5xf32>
    %131 = arith.select %129, %61, %130 : vector<8x5xi1>, vector<8x5xf32>
    %cst_12 = arith.constant dense<0.000000e+00> : vector<8xf32>
    %132 = vector.multi_reduction <add>, %131, %cst_12 [1] : vector<8x5xf32> to vector<8xf32>
    %133 = vector.shape_cast %132 : vector<8xf32> to vector<8x1xf32>
    %134 = arith.subf %70, %133 : vector<8x1xf32>
    %135 = vector.shape_cast %134 : vector<8x1xf32> to vector<1x8x1xf32>
    %cst_13 = arith.constant dense<0.000000e+00> : vector<1xf32>
    %136 = vector.multi_reduction <add>, %135, %cst_13 [1, 2] : vector<1x8x1xf32> to vector<1xf32>
    %137 = vector.shape_cast %136 : vector<1xf32> to vector<1x1x1xf32>
    %138 = vector.extract %137[0, 0, 0] : f32 from vector<1x1x1xf32>
    %cst_14 = arith.constant 1.250000e-01 : f32
    %139 = arith.mulf %138, %cst_14 : f32
    %cst_15 = arith.constant 0.000000e+00 : f32
    %140 = vector.broadcast %cst_15 : f32 to vector<8x1xf32>
    %141 = vector.broadcast %139 : f32 to vector<8x1xf32>
    %142 = arith.addf %140, %141 : vector<8x1xf32>
    %cst_16 = arith.constant 0.000000e+00 : f32
    %143 = vector.broadcast %cst_16 : f32 to vector<8x122xf32>
    %144 = tpu.concatenate %61, %142, %143 in 1 : vector<8x5xf32>, vector<8x1xf32>, vector<8x122xf32> -> vector<8x128xf32>
    %c0_17 = arith.constant 0 : index
    %c0_18 = arith.constant 0 : index
    %145 = vector.load %arg3[%c0_17, %c0_18] : memref<8x128xf32, #tpu.memory_space<vmem>>, vector<8x128xf32>
    tpu.vector_store %arg3[%c0_17, %c0_18], %144 {strides = array<i32>} : memref<8x128xf32, #tpu.memory_space<vmem>>, vector<8x128xf32>,
    return
  }
}

</mosaic_0001>

<bundles_post_ra>
// kernel: qnn_forward_impl.1
= control target key start
LH: loop header
LB: loop body
LE: loop exit
PB: predicated region body
PF: predicated region fallthrough
CT: control target
= control target key end

     0   :  { %8 = vsyncpa [#allocation3], 0  ;;  %s497_s0 = inlined_call_operand.vmem [shape: f32[16,32], index: 0, kind: input, shape index: {}]   ;;  %s498_s1 = inlined_call_operand.hbm [shape: bf16[32,320], index: 1, kind: input, shape index: {}]   ;;  %s499_s2 = inlined_call_operand.vmem [shape: s32[8], index: 2, kind: input, shape index: {}]   ;;  %s500_s3 = inlined_call_operand.vmem [shape: f32[8,128], index: 3, kind: output, shape index: {}]  }
   0x1   :  { %9 = vsyncpa [#allocation4], 0  ;;  %s433_s12 = smov [#allocation2]   ;;  %s30_s16 = sshll.u32 %s499_s2, 4  ;;  %s31_s16 = int_to_ptr.vmem [resolvable:$true] %s30_s16 }
   0x2   :  { %s17_s13 = sshll.u32 %s433_s12, 4  ;;  %s18_s13 = int_to_ptr.vmem [resolvable:$true] %s17_s13 }
   0x3   :  { %s405_s17 = scalar_lea.vmem %s18_s13, 768  ;;  %p410_p1 = scmp.lt.s32.totalorder %s18_s13, %s18_s13 }
   0x4   :  { %p406_p0 = scmp.ne.s32.totalorder %s18_s13, %s405_s17  ;;  %p411_p2 = scmp.lt.s32.totalorder %s405_s17, %s405_s17 }
   0x6   :  { %p412_p3 = por %p411_p2, %p410_p1 }
   0x8   :  { %p413_p4 = pnand %p412_p3, %p406_p0 }
   0xa   :  { %416 = shalt.err (!%p413_p4)
}
   0xb   :  { %s434_s18 = smov 192   ;;  %s435_s19 = smov 12  }
   0xc   :  { %23 = dma.hbm_to_vmem [thread:$0]  %s498_s1, 768, %s18_s13, [#allocation3], %s434_s18, %s434_s18, %s435_s19  }
   0xd   :  { %s417_s22 = scalar_lea.vmem %s31_s16, 16  ;;  %p422_p6 = scmp.lt.s32.totalorder %s31_s16, %s31_s16 }
   0xe   :  { %p418_p5 = scmp.ne.s32.totalorder %s31_s16, %s417_s22  ;;  %p423_p7 = scmp.lt.s32.totalorder %s417_s22, %s417_s22 }
  0x10   :  { %p424_p8 = por %p423_p7, %p422_p6 }
  0x12   :  { %p425_p9 = pnand %p424_p8, %p418_p5 }
  0x14   :  { %428 = shalt.err (!%p425_p9)
}
  0x15   :  { %s436_s2 = smov [#allocation5]  }
  0x16   :  { %33 = dma.vmem_to_smem %s31_s16, 16, %s436_s2, [#allocation4]  }
  0x17   :  { %429 = dma.done.wait [#allocation3], 768  }
  0x18   :  { %430 = vsyncadd [#allocation3], 4294966528 }
  0x19   :  { %431 = dma.done.wait [#allocation4], 16  }
  0x1a   :  { %432 = vsyncadd [#allocation4], 4294967280 }
  0x1b   :  { %40 = sfence }
  0x1c   :  { %v385_v0 = vld [vmem:[#allocation2 + $0x1c] ss:$12 sps:$4 sm:$0xff]   ;;  %v437_v1 = vmov 0.0   ;;  %v387_v2 = vld [vmem:[#allocation2 + $0x20] ss:$12 sps:$4 sm:$0xff]   ;;  %vm438_vm0 = vmmov 0   ;;  %v268_v55 = vlaneseq }
  0x1d   :  { %365 = vmatprep.subr.bf16.mxu1 %v437_v1  ;;  %369 = vmatprep.mubr.msk.bf16.mxu1 %vm438_vm0, %v437_v1  ;;  %v388_v3 = vld [vmem:[#allocation2 + $0x18] ss:$12 sps:$4 sm:$0xff]   ;;  %v439_v5 = vmov 0   ;;  %v391_v6 = vld [vmem:[#allocation2 + $0x8] ss:$12 sps:$4 sm:$0xff]   ;;  %vm85_vm1 = vcmask 261120  }
  0x1e   :  { %101 = vmatprep.subr.bf16.mxu0 %v385_v0  ;;  %366 = vmatpush3.bf16.msra.mxu1 %v387_v2  ;;  %v389_v4 = vld [vmem:[#allocation2 + $0x4] ss:$12 sps:$4 sm:$0xff]   ;;  %v392_v7 = vld [vmem:[#allocation2] ss:$12 sps:$4 sm:$0xff]   ;;  %s440_s26 = smov 96   ;;  %s442_s27 = smov 32  }
  0x1f   :  { %121 = vmatprep.mubr.bf16.mxu0 %v439_v5  ;;  %102 = vmatpush1.bf16.msra.mxu0 %v388_v3  ;;  %v42_v8 = vld [vmem:[%s497_s0] sm:$0xff]  ;;  %v43_v9 = vld [vmem:[%s497_s0 + $0x8] sm:$0xff]  ;;  %s441_s0 = smov 64   ;;  %s273_s28 = sld [smem:[#allocation5]]  ;;  %v269_v56 = vshrl.u32 %v268_v55, 7  ;;  %v271_v57 = vand.u32 127, %v268_v55 }
  0x20   :  { %367 = vmatprep.subr.bf16.mxu1 %v437_v1  ;;  %103 = vmatprep.subr.bf16.mxu0 %v389_v4  ;;  %v44_v10 = vpack.c.bf16 %v43_v9, %v42_v8  ;;  %s355_s29 = sld [smem:[#allocation5 + $0x1]] }
  0x21   :  { %s356_s30 = sld [smem:[#allocation5 + $0x2]]  ;;  %vm272_vm2 = vcmp.eq.s32.totalorder %v269_v56, 0  ;;  %vm277_vm4 = vcmp.eq.s32.totalorder %v269_v56, 1  ;;  %vm283_vm8 = vcmp.eq.s32.totalorder %v269_v56, 2  ;;  %vm289_vm12 = vcmp.eq.s32.totalorder %v269_v56, 3 }
  0x22   :  { %368 = vmatpush3.bf16.msra.mxu1 %v391_v6  ;;  %s357_s4 = sld [smem:[#allocation5 + $0x3]]  ;;  %vm295_vm0 = vcmp.eq.s32.totalorder %v269_v56, 4 }
  0x23   :  { %104 = vmatpush1.bf16.msra.mxu0 %v392_v7  ;;  %s358_s5 = sld [smem:[#allocation5 + $0x4]] }
  0x24   :  { %s359_s6 = sld [smem:[#allocation5 + $0x5]] }
  0x25   :  { %370 = vmatmul.mubr.msk.bf16.vlgmr.msra.gmra.mxu1 %vm85_vm1, %v44_v10  ;;  %v274_v58 = vstv %s273_s28  ;;  %s360_s7 = sld [smem:[#allocation5 + $0x6]] }
  0x26   :  { %353 = vmatmul.mubr.msk.bf16.vlgmr.msra.gmra.mxu0 %vm85_vm1, %v44_v10  ;;  %v279_v59 = vstv %s355_s29  ;;  %vm275_vm3 = vcmp.eq.s32.totalorder %v271_v57, %v274_v58  ;;  %s361_s8 = sld [smem:[#allocation5 + $0x7]] }
  0x27   :  { %vm280_vm5 = vcmp.eq.s32.totalorder %v271_v57, %v279_v59  ;;  %v285_v60 = vstv %s356_s30  ;;  %vm276_vm6 = vmand %vm272_vm2, %vm275_vm3 }
  0x28   :  { %vm281_vm7 = vmand %vm277_vm4, %vm280_vm5  ;;  %vm286_vm9 = vcmp.eq.s32.totalorder %v271_v57, %v285_v60  ;;  %v291_v61 = vstv %s357_s4  ;;  %vm301_vm4 = vcmp.eq.s32.totalorder %v269_v56, 5 }
  0x29   :  { %vm282_vm10 = vmor %vm276_vm6, %vm281_vm7  ;;  %vm292_vm13 = vcmp.eq.s32.totalorder %v271_v57, %v291_v61  ;;  %v297_v62 = vstv %s358_s5 }
  0x2a   :  { %vm287_vm11 = vmand %vm283_vm8, %vm286_vm9  ;;  %v303_v63 = vstv %s359_s6  ;;  %vm307_vm8 = vcmp.eq.s32.totalorder %v269_v56, 6 }
  0x2b   :  { %vm288_vm14 = vmor %vm282_vm10, %vm287_vm11  ;;  %vm304_vm5 = vcmp.eq.s32.totalorder %v271_v57, %v303_v63  ;;  %v309_v0 = vstv %s360_s7 }
  0x2c   :  { %vm293_vm15 = vmand %vm289_vm12, %vm292_vm13  ;;  %vm310_vm9 = vcmp.eq.s32.totalorder %v271_v57, %v309_v0  ;;  %v315_v3 = vstv %s361_s8  ;;  %vm313_vm12 = vcmp.eq.s32.totalorder %v269_v56, 7 }
  0x2d   :  { %vm294_vm2 = vmor %vm288_vm14, %vm293_vm15  ;;  %vm316_vm13 = vcmp.eq.s32.totalorder %v271_v57, %v315_v3  ;;  %vm247_vm14 = vcmask 7168   ;;  %vm249_vm15 = vcmask 15360  }
  0x2e   :  { %vm305_vm7 = vmand %vm301_vm4, %vm304_vm5  ;;  %vm255_vm4 = vcmask 39936  }
  0x2f   :  { %vm311_vm11 = vmand %vm307_vm8, %vm310_vm9 }
  0xe5   :  { %v166_v11 = vpop.f32.mrf.mxu1 }
  0xe6   :  { %v123_v12 = vpop.f32.mrf.mxu0 }
  0xe7   :  { %v371_v13 = vpop.f32.mrf.mxu1 }
  0xe8   :  { %v125_v14 = vpop.f32.mrf.mxu0 }
  0xe9   :  { %v169_v15 = vpop.f32.mrf.mxu1 }
  0xea   :  { %216 = vrot.lane.b32.xlu1 %v169_v15, %s440_s26  ;;  %v127_v16 = vpop.f32.mrf.mxu0 }
  0xeb   :  { %v372_v17 = vpop.f32.mrf.mxu1 }
  0xec   :  { %v129_v18 = vpop.f32.mrf.mxu0 }
  0xed   :  { %174 = vrot.lane.b32.xlu0 %v129_v18, %s440_s26 }
  0xee   :  { %221 = vrot.lane.b32.xlu1 %v166_v11, %s440_s26 }
  0xf1   :  { %179 = vrot.lane.b32.xlu0 %v125_v14, %s440_s26 }
 0x15c   :  { %v217_v21 = vpop.permute.xlu1 %216 }
 0x15d   :  { %v219_v24 = vsub.f32 %v123_v12, %v217_v21  ;;  %v239_v33 = vsub.f32 %v125_v14, %v217_v21 }
 0x15f   :  { %v175_v19 = vpop.permute.xlu0 %174  ;;  %v241_v39 = vmul.f32 %v239_v33, %v42_v8 }
 0x160   :  { %v177_v20 = vsub.f32 %v123_v12, %v175_v19  ;;  %v222_v25 = vpop.permute.xlu1 %221 }
 0x161   :  { %v224_v26 = vadd.f32 %v222_v25, %v127_v16  ;;  %v240_v32 = vadd.f32 %v222_v25, %v129_v18 }
 0x162   :  { %190 = vrot.lane.b32.xlu0 %v177_v20, %s440_s26  ;;  %v183_v28 = vmul.f32 %v177_v20, %v42_v8 }
 0x163   :  { %v180_v22 = vpop.permute.xlu0 %179  ;;  %v242_v36 = vmul.f32 %v240_v32, %v43_v9 }
 0x164   :  { %v182_v23 = vadd.f32 %v180_v22, %v127_v16 }
 0x165   :  { %v243_v45 = vadd.f32 %v242_v36, %v241_v39 }
 0x166   :  { %203 = vrot.lane.b32.xlu0 %v177_v20, %s441_s0  ;;  %195 = vrot.lane.b32.xlu1 %v182_v23, %s440_s26  ;;  %v184_v27 = vmul.f32 %v182_v23, %v43_v9 }
 0x167   :  { %v244_v52 = vsel %vm85_vm1, %v243_v45, 0.0 }
 0x168   :  { %v185_v29 = vadd.f32 %v184_v27, %v183_v28 }
 0x16a   :  { %226 = vrot.lane.b32.xlu0 %v219_v24, %s442_s27  ;;  %207 = vrot.lane.b32.xlu1 %v182_v23, %s441_s0  ;;  %v186_v30 = vsel %vm85_vm1, %v185_v29, 0.0 }
 0x16e   :  { %231 = vrot.lane.b32.xlu1 %v224_v26, %s442_s27 }
 0x189   :  { %187 = vadd.xlane.f32.xlu0 %v186_v30 }
 0x1d4   :  { %v191_v31 = vpop.permute.xlu0 %190 }
 0x1d5   :  { %v193_v37 = vmul.f32 %v191_v31, %v42_v8 }
 0x1d8   :  { %v196_v34 = vpop.permute.xlu1 %195  ;;  %v204_v35 = vpop.permute.xlu0 %203 }
 0x1d9   :  { %v198_v38 = vmul.f32 %v196_v34, %v43_v9  ;;  %v206_v42 = vmul.f32 %v204_v35, %v42_v8 }
 0x1db   :  { %v199_v40 = vadd.f32 %v198_v38, %v193_v37 }
 0x1dc   :  { %v208_v41 = vpop.permute.xlu1 %207  ;;  %v227_v46 = vpop.permute.xlu0 %226 }
 0x1dd   :  { %v210_v43 = vmul.f32 %v208_v41, %v43_v9  ;;  %v200_v44 = vsel %vm85_vm1, %v199_v40, 0.0  ;;  %v229_v49 = vmul.f32 %v227_v46, %v42_v8 }
 0x1de   :  { %201 = vadd.xlane.f32.xlu1 %v200_v44 }
 0x1df   :  { %v211_v47 = vadd.f32 %v210_v43, %v206_v42 }
 0x1e0   :  { %v232_v48 = vpop.permute.xlu1 %231 }
 0x1e1   :  { %v234_v50 = vmul.f32 %v232_v48, %v43_v9  ;;  %v212_v51 = vsel %vm85_vm1, %v211_v47, 0.0 }
 0x1e2   :  { %213 = vadd.xlane.f32.xlu0 %v212_v51  ;;  %245 = vadd.xlane.f32.xlu1 %v244_v52 }
 0x1e3   :  { %v235_v53 = vadd.f32 %v234_v50, %v229_v49 }
 0x1e5   :  { %v236_v54 = vsel %vm85_vm1, %v235_v53, 0.0  ;;  %vm298_vm1 = vcmp.eq.s32.totalorder %v271_v57, %v297_v62 }
 0x1e6   :  { %237 = vadd.xlane.f32.xlu0 %v236_v54  ;;  %vm299_vm3 = vmand %vm295_vm0, %vm298_vm1  ;;  %vm251_vm1 = vcmask 23552  }
 0x1e7   :  { %vm482_vm6 = vmor %vm294_vm2, %vm299_vm3  ;;  %vm253_vm3 = vcmask 31744  }
 0x1e8   :  { %vm306_vm10 = vmor %vm482_vm6, %vm305_vm7  ;;  %vm338_vm6 = vcmask 48128  }
 0x1e9   :  { %vm312_vm0 = vmor %vm306_vm10, %vm311_vm11 }
 0x1ea   :  { %vm317_vm2 = vmand %vm313_vm12, %vm316_vm13 }
 0x1eb   :  { %vm318_vm5 = vmor %vm312_vm0, %vm317_vm2 }
 0x212   :  { %v188_v2 = vpop.xlane.xlu0 %187 }
 0x267   :  { %v202_v4 = vpop.xlane.xlu1 %201 }
 0x268   :  { %v248_v6 = vsel %vm247_vm14, %v188_v2, %v202_v4 }
 0x26b   :  { %v214_v5 = vpop.xlane.xlu0 %213  ;;  %v246_v9 = vpop.xlane.xlu1 %245 }
 0x26c   :  { %v250_v7 = vsel %vm249_vm15, %v248_v6, %v214_v5 }
 0x26f   :  { %v238_v8 = vpop.xlane.xlu0 %237 }
 0x270   :  { %v252_v10 = vsel %vm251_vm1, %v250_v7, %v238_v8 }
 0x271   :  { %v254_v11 = vsel %vm253_vm3, %v252_v10, %v246_v9 }
 0x272   :  { %v256_v12 = vsel %vm255_vm4, %v254_v11, -inf  ;;  %v319_v13 = vsel %vm318_vm5, %v254_v11, 0.0 }
 0x273   :  { %257 = vmax.xlane.f32.xlu0 %v256_v12  ;;  %v320_v14 = vsel %vm255_vm4, %v319_v13, 0.0 }
 0x277   :  { %321 = vadd.xlane.f32.xlu0 %v320_v14 }
 0x2fc   :  { %v258_v15 = vpop.xlane.xlu0 %257 }
 0x2fd   :  { %v259_v16 = vsub.f32 %v254_v11, %v258_v15 }
 0x2ff   :  { %v260_v17 = vmul.f32 1.442695, %v259_v16 }
 0x300   :  { %v322_v24 = vpop.xlane.xlu0 %321 }
 0x301   :  { %393 = vpow2.f32 %v260_v17 }
 0x30e   :  { %v394_v18 = vpop.eup %393 }
 0x30f   :  { %v262_v19 = vsel %vm255_vm4, %v394_v18, 0.0 }
 0x310   :  { %263 = vadd.xlane.f32.xlu1 %v262_v19 }
 0x399   :  { %v264_v20 = vpop.xlane.xlu1 %263 }
 0x39a   :  { %395 = vlog2.f32 %v264_v20 }
 0x3a7   :  { %v396_v21 = vpop.eup %395 }
 0x3a8   :  { %v266_v22 = vmul.f32 0.6931472, %v396_v21 }
 0x3aa   :  { %v267_v23 = vadd.f32 %v266_v22, %v258_v15 }
 0x3ac   :  { %v323_v25 = vsub.f32 %v267_v23, %v322_v24 }
 0x3ae   :  { %v324_v26 = vsel %vm247_vm14, %v323_v25, 0.0 }
 0x3af   :  { %325 = vadd.xlane.f32.xlu1 %v324_v26 }
 0x438   :  { %v326_v27 = vpop.xlane.xlu1 %325 }
 0x439   :  { %v327_v28 = vrot.slane %v326_v27, 4 }
 0x43b   :  { %v328_v29 = vadd.f32 %v327_v28, %v326_v27 }
 0x43d   :  { %v329_v30 = vrot.slane %v328_v29, 2 }
 0x43f   :  { %v330_v31 = vadd.f32 %v329_v30, %v328_v29 }
 0x441   :  { %v331_v32 = vrot.slane %v330_v31, 1 }
 0x443   :  { %v332_v33 = vadd.f32 %v331_v32, %v330_v31 }
 0x445   :  { %373 = vpush %v332_v33 }
 0x476   :  { %s374_s9 = spop %373 }
 0x477   :  { %s334_s10 = smul.f32 0.125, %s374_s9 }
 0x479   :  { %v335_v34 = vstv %s334_s10 }
 0x47a   :  { %v337_v35 = vsel %vm255_vm4, %v254_v11, %v335_v34 }
 0x47b   :  { %v339_v36 = vsel %vm338_vm6, %v337_v35, 0.0 }
 0x47c   :  { %340 = vst [vmem:[%s500_s3] sm:$0xff] %v339_v36 }
 0x47d   :  { %345 = vsyncpa [#allocation3], 1 }
 0x47e   :  { %346 = vsyncpa [#allocation4], 1 }

</bundles_post_ra>
